<compile_context>
chip_gen: v7x
topology: tpu7x:2x2x1
jax: 0.10.0
libtpu: 0.0.40
codegen_flags: <defaults>
</compile_context>

<pallas_src>
from collections import defaultdict

import jax
import jax.numpy as jnp
from jax import lax
from jax.experimental import pallas as pl
from jax.experimental.pallas import tpu as pltpu


# dot_general dimension numbers (feed the MXU directly, no in-kernel .T)
_DN_NT = (((1,), (1,)), ((), ()))   # (M,K) x (N,K) -> (M,N)   "x @ W^T"
_DN_TN = (((0,), (0,)), ((), ()))   # (K,M) x (K,N) -> (M,N)   "A^T @ B"
_DN_NN = (((1,), (0,)), ((), ()))   # (M,K) x (K,N) -> (M,N)   plain matmul


def _sumsq(g):
    """sum(g**2) as a (1, 1) array using only keepdims reductions."""
    s = jnp.sum(g * g, axis=1, keepdims=True)
    return jnp.sum(s, axis=0, keepdims=True)


def _trace_fim_kernel(x_ref, w1_ref, b1_ref, w2_ref, b2_ref, w3_ref, b3_ref,
                      g_ref, out_ref):
    """Fused FIM-trace kernel.

    out_ref (1, 8) f32:
      [0..5] = sum(grad**2) for (w1, b1, w2, b2, w3, b3)
      [6]    = mean cross-entropy loss w.r.t. the sampled labels
      [7]    = unused (0)
    """
    f32, bf16 = jnp.float32, jnp.bfloat16

    x = x_ref[...]                                   # (N, D)  f32
    x_bf = x.astype(bf16)
    w1_bf = w1_ref[...].astype(bf16)                 # (H1, D)
    w2_bf = w2_ref[...].astype(bf16)                 # (H2, H1)
    w3_bf = w3_ref[...].astype(bf16)                 # (C,  H2)

    # ---- fused MLP forward (bf16 MXU operands, f32 accumulation) ----------
    z1 = lax.dot_general(x_bf, w1_bf, _DN_NT, preferred_element_type=f32) + b1_ref[...]
    h1 = jnp.maximum(z1, 0.0)
    h1_bf = h1.astype(bf16)
    z2 = lax.dot_general(h1_bf, w2_bf, _DN_NT, preferred_element_type=f32) + b2_ref[...]
    h2 = jnp.maximum(z2, 0.0)
    h2_bf = h2.astype(bf16)
    logits = lax.dot_general(h2_bf, w3_bf, _DN_NT, preferred_element_type=f32) + b3_ref[...]
    n, c = logits.shape
    inv_n = f32(1.0 / n)

    # ---- y ~ Categorical(logits): Gumbel-max with pre-drawn noise ---------
    class_ids = lax.broadcasted_iota(jnp.int32, (n, c), 1)
    scores = logits + g_ref[...]
    is_max = scores == jnp.max(scores, axis=1, keepdims=True)
    y = jnp.min(jnp.where(is_max, class_ids, c), axis=1, keepdims=True)    # (N,1)
    onehot = (class_ids == y).astype(f32)                                  # (N,C)

    # ---- mean softmax-CE loss (stabilized) ---------------------------------
    m = jnp.max(logits, axis=1, keepdims=True)
    e = jnp.exp(logits - m)
    se = jnp.sum(e, axis=1, keepdims=True)
    probs = e / se
    lse = jnp.log(se) + m
    label_logit = jnp.sum(logits * onehot, axis=1, keepdims=True)
    loss = jnp.sum(lse - label_logit, axis=0, keepdims=True) * inv_n       # (1,1)

    # ---- analytic backprop (replaces torch.autograd.grad) ------------------
    dz3 = (probs - onehot) * inv_n                                         # (N,C)
    dz3_bf = dz3.astype(bf16)
    gw3 = lax.dot_general(dz3_bf, h2_bf, _DN_TN, preferred_element_type=f32)   # (C,H2)
    gb3 = jnp.sum(dz3, axis=0, keepdims=True)                                  # (1,C)

    dh2 = lax.dot_general(dz3_bf, w3_bf, _DN_NN, preferred_element_type=f32)   # (N,H2)
    dz2 = jnp.where(h2 > 0.0, dh2, 0.0)
    dz2_bf = dz2.astype(bf16)
    gw2 = lax.dot_general(dz2_bf, h1_bf, _DN_TN, preferred_element_type=f32)   # (H2,H1)
    gb2 = jnp.sum(dz2, axis=0, keepdims=True)

    dh1 = lax.dot_general(dz2_bf, w2_bf, _DN_NN, preferred_element_type=f32)   # (N,H1)
    dz1 = jnp.where(h1 > 0.0, dh1, 0.0)
    dz1_bf = dz1.astype(bf16)
    gw1 = lax.dot_general(dz1_bf, x_bf, _DN_TN, preferred_element_type=f32)    # (H1,D)
    gb1 = jnp.sum(dz1, axis=0, keepdims=True)

    # ---- per-parameter traces packed into one merged output ----------------
    vals = (_sumsq(gw1), _sumsq(gb1), _sumsq(gw2), _sumsq(gb2),
            _sumsq(gw3), _sumsq(gb3), loss)
    lane = lax.broadcasted_iota(jnp.int32, (1, 8), 1)
    packed = jnp.zeros((1, 8), f32)
    for slot, val in enumerate(vals):
        packed = jnp.where(lane == slot, val, packed)
    out_ref[...] = packed


def trace_fim_pallas(x_flat, params, gumbel):
    """Single pallas_call: all six per-parameter FIM traces (+ loss)."""
    (w1, b1), (w2, b2), (w3, b3) = params
    vmem = pl.BlockSpec(memory_space=pltpu.MemorySpace.VMEM)
    out = pl.pallas_call(
        _trace_fim_kernel,
        in_specs=[vmem] * 8,
        out_specs=vmem,
        out_shape=jax.ShapeDtypeStruct((1, 8), jnp.float32),
    )(x_flat, w1, b1, w2, b2, w3, b3, gumbel)
    return out[0]                                                          # (8,)


@jax.jit
def trace_fim_step(params, x_held_out, key):
    n = x_held_out.shape[0]
    num_classes = params[-1][0].shape[0]
    x_flat = x_held_out.reshape(n, -1)                 # x.view(N, -1)
    gumbel = jax.random.gumbel(key, (n, num_classes), jnp.float32)
    return trace_fim_pallas(x_flat, params, gumbel)


def init_linear(key, out_dim, in_dim):
    # PyTorch nn.Linear default init; bias kept 2-D (1, out) for >=2-D refs.
    kw, kb = jax.random.split(key)
    bound = 1.0 / jnp.sqrt(jnp.float32(in_dim))
    w = jax.random.uniform(kw, (out_dim, in_dim), jnp.float32, -bound, bound)
    b = jax.random.uniform(kb, (1, out_dim), jnp.float32, -bound, bound)
    return w, b


if __name__ == "__main__":
    key = jax.random.PRNGKey(0)
    k_l1, k_l2, k_l3, k_x, k_sample = jax.random.split(key, 5)

    # Small shapes implied by the module: NCHW held-out batch -> MLP "model".
    N, C_IMG, H_IMG, W_IMG = 16, 4, 8, 8
    IN_DIM = C_IMG * H_IMG * W_IMG                     # 256
    HID1, HID2, NUM_CLASSES = 64, 32, 10
    step = 0

    model_params = (
        init_linear(k_l1, HID1, IN_DIM),
        init_linear(k_l2, HID2, HID1),
        init_linear(k_l3, NUM_CLASSES, HID2),
    )
    param_names = ("layer1.weight", "layer1.bias",
                   "layer2.weight", "layer2.bias",
                   "layer3.weight", "layer3.bias")
    # TODO(synk): get_every_but_forbidden_parameter_names filters params by
    # layer type (norm/embedding layers excluded) — pure Python introspection
    # with no kernel equivalent; for an all-Linear MLP every param is penalized.
    penalized_parameter_names = set(param_names)

    x_held_out = jax.random.normal(k_x, (N, C_IMG, H_IMG, W_IMG), jnp.float32)

    out = trace_fim_step(model_params, x_held_out, k_sample)
    out = jax.block_until_ready(out)
    if not bool(jnp.all(jnp.isfinite(out))):
        raise SystemExit("non-finite FIM traces")

    evaluators = defaultdict(float)
    overall_trace = 0.0
    for i, name in enumerate(param_names):
        trace_p = float(out[i])
        evaluators[f"trace_fim/{name}"] += trace_p
        if name in penalized_parameter_names:
            overall_trace += trace_p
    evaluators["trace_fim/overall_trace"] = overall_trace
    evaluators["steps/trace_fim"] = step
    # TODO(synk): self.logger.log_scalars(evaluators, step) has no kernel
    # equivalent; the evaluators dict is the forward's result.

    print("KERNEL_OK")
</pallas_src>

<mosaic_0001>
module attributes {stable_mosaic.version = 11 : i64} {
  func.func @_trace_fim_kernel(%arg0: memref<16x256xf32, #tpu.memory_space<vmem>>, %arg1: memref<64x256xf32, #tpu.memory_space<vmem>>, %arg2: memref<1x64xf32, #tpu.memory_space<vmem>>, %arg3: memref<32x64xf32, #tpu.memory_space<vmem>>, %arg4: memref<1x32xf32, #tpu.memory_space<vmem>>, %arg5: memref<10x32xf32, #tpu.memory_space<vmem>>, %arg6: memref<1x10xf32, #tpu.memory_space<vmem>>, %arg7: memref<16x10xf32, #tpu.memory_space<vmem>>, %arg8: memref<1x8xf32, #tpu.memory_space<vmem>>) attributes {dimension_semantics = [], scalar_prefetch = 0 : i64, scratch_operands = 0 : i64, tpu.core_type = #tpu.core_type<tc>} {
    %c0 = arith.constant 0 : index
    %c0_0 = arith.constant 0 : index
    %0 = vector.load %arg0[%c0, %c0_0] : memref<16x256xf32, #tpu.memory_space<vmem>>, vector<16x256xf32>
    %1 = arith.truncf %0 : vector<16x256xf32> to vector<16x256xbf16>
    %c0_1 = arith.constant 0 : index
    %c0_2 = arith.constant 0 : index
    %2 = vector.load %arg1[%c0_1, %c0_2] : memref<64x256xf32, #tpu.memory_space<vmem>>, vector<64x256xf32>
    %3 = arith.truncf %2 : vector<64x256xf32> to vector<64x256xbf16>
    %c0_3 = arith.constant 0 : index
    %c0_4 = arith.constant 0 : index
    %4 = vector.load %arg3[%c0_3, %c0_4] : memref<32x64xf32, #tpu.memory_space<vmem>>, vector<32x64xf32>
    %5 = arith.truncf %4 : vector<32x64xf32> to vector<32x64xbf16>
    %c0_5 = arith.constant 0 : index
    %c0_6 = arith.constant 0 : index
    %6 = vector.load %arg5[%c0_5, %c0_6] : memref<10x32xf32, #tpu.memory_space<vmem>>, vector<10x32xf32>
    %7 = arith.truncf %6 : vector<10x32xf32> to vector<10x32xbf16>
    %cst = arith.constant dense<0.000000e+00> : vector<16x64xf32>
    %8 = tpu.matmul %1, %3, %cst {dimension_numbers = #tpu.dot_dimension_numbers<[1], [1], [0], [0], [0, 0, 1, 0], [], []>} : vector<16x256xbf16>, vector<64x256xbf16>, vector<16x64xf32> -> vector<16x64xf32>
    %c0_7 = arith.constant 0 : index
    %c0_8 = arith.constant 0 : index
    %9 = vector.load %arg2[%c0_7, %c0_8] : memref<1x64xf32, #tpu.memory_space<vmem>>, vector<1x64xf32>
    %10 = vector.broadcast %9 : vector<1x64xf32> to vector<16x64xf32>
    %11 = arith.addf %8, %10 : vector<16x64xf32>
    %cst_9 = arith.constant 0.000000e+00 : f32
    %12 = vector.broadcast %cst_9 : f32 to vector<16x64xf32>
    %13 = arith.maximumf %11, %12 : vector<16x64xf32>
    %14 = arith.truncf %13 : vector<16x64xf32> to vector<16x64xbf16>
    %cst_10 = arith.constant dense<0.000000e+00> : vector<16x32xf32>
    %15 = tpu.matmul %14, %5, %cst_10 {dimension_numbers = #tpu.dot_dimension_numbers<[1], [1], [0], [0], [0, 0, 1, 0], [], []>} : vector<16x64xbf16>, vector<32x64xbf16>, vector<16x32xf32> -> vector<16x32xf32>
    %c0_11 = arith.constant 0 : index
    %c0_12 = arith.constant 0 : index
    %16 = vector.load %arg4[%c0_11, %c0_12] : memref<1x32xf32, #tpu.memory_space<vmem>>, vector<1x32xf32>
    %17 = vector.broadcast %16 : vector<1x32xf32> to vector<16x32xf32>
    %18 = arith.addf %15, %17 : vector<16x32xf32>
    %cst_13 = arith.constant 0.000000e+00 : f32
    %19 = vector.broadcast %cst_13 : f32 to vector<16x32xf32>
    %20 = arith.maximumf %18, %19 : vector<16x32xf32>
    %21 = arith.truncf %20 : vector<16x32xf32> to vector<16x32xbf16>
    %cst_14 = arith.constant dense<0.000000e+00> : vector<16x10xf32>
    %22 = tpu.matmul %21, %7, %cst_14 {dimension_numbers = #tpu.dot_dimension_numbers<[1], [1], [0], [0], [0, 0, 1, 0], [], []>} : vector<16x32xbf16>, vector<10x32xbf16>, vector<16x10xf32> -> vector<16x10xf32>
    %c0_15 = arith.constant 0 : index
    %c0_16 = arith.constant 0 : index
    %23 = vector.load %arg6[%c0_15, %c0_16] : memref<1x10xf32, #tpu.memory_space<vmem>>, vector<1x10xf32>
    %24 = vector.broadcast %23 : vector<1x10xf32> to vector<16x10xf32>
    %25 = arith.addf %22, %24 : vector<16x10xf32>
    %26 = tpu.iota {dimensions = array<i32: 1>} : vector<16x10xi32>
    %c0_17 = arith.constant 0 : index
    %c0_18 = arith.constant 0 : index
    %27 = vector.load %arg7[%c0_17, %c0_18] : memref<16x10xf32, #tpu.memory_space<vmem>>, vector<16x10xf32>
    %28 = arith.addf %25, %27 : vector<16x10xf32>
    %cst_19 = arith.constant dense<0xFF800000> : vector<16xf32>
    %29 = vector.multi_reduction <maximumf>, %28, %cst_19 [1] : vector<16x10xf32> to vector<16xf32>
    %30 = vector.shape_cast %29 : vector<16xf32> to vector<16x1xf32>
    %31 = vector.broadcast %30 : vector<16x1xf32> to vector<16x10xf32>
    %32 = arith.cmpf oeq, %28, %31 : vector<16x10xf32>
    %c10_i32 = arith.constant 10 : i32
    %33 = vector.broadcast %c10_i32 : i32 to vector<16x10xi32>
    %34 = arith.select %32, %26, %33 : vector<16x10xi1>, vector<16x10xi32>
    %cst_20 = arith.constant dense<2147483647> : vector<16xi32>
    %35 = vector.multi_reduction <minsi>, %34, %cst_20 [1] : vector<16x10xi32> to vector<16xi32>
    %36 = vector.shape_cast %35 : vector<16xi32> to vector<16x1xi32>
    %37 = vector.broadcast %36 : vector<16x1xi32> to vector<16x10xi32>
    %38 = arith.cmpi eq, %26, %37 : vector<16x10xi32>
    %39 = arith.extui %38 : vector<16x10xi1> to vector<16x10xi32>
    %40 = arith.sitofp %39 : vector<16x10xi32> to vector<16x10xf32>
    %cst_21 = arith.constant dense<0xFF800000> : vector<16xf32>
    %41 = vector.multi_reduction <maximumf>, %25, %cst_21 [1] : vector<16x10xf32> to vector<16xf32>
    %42 = vector.shape_cast %41 : vector<16xf32> to vector<16x1xf32>
    %43 = vector.broadcast %42 : vector<16x1xf32> to vector<16x10xf32>
    %44 = arith.subf %25, %43 : vector<16x10xf32>
    %45 = math.exp %44 : vector<16x10xf32>
    %cst_22 = arith.constant dense<0.000000e+00> : vector<16xf32>
    %46 = vector.multi_reduction <add>, %45, %cst_22 [1] : vector<16x10xf32> to vector<16xf32>
    %47 = vector.shape_cast %46 : vector<16xf32> to vector<16x1xf32>
    %48 = vector.broadcast %47 : vector<16x1xf32> to vector<16x10xf32>
    %49 = arith.divf %45, %48 : vector<16x10xf32>
    %50 = math.log %47 : vector<16x1xf32>
    %51 = arith.addf %50, %42 : vector<16x1xf32>
    %52 = arith.mulf %25, %40 : vector<16x10xf32>
    %cst_23 = arith.constant dense<0.000000e+00> : vector<16xf32>
    %53 = vector.multi_reduction <add>, %52, %cst_23 [1] : vector<16x10xf32> to vector<16xf32>
    %54 = vector.shape_cast %53 : vector<16xf32> to vector<16x1xf32>
    %55 = arith.subf %51, %54 : vector<16x1xf32>
    %cst_24 = arith.constant dense<0.000000e+00> : vector<1xf32>
    %56 = vector.multi_reduction <add>, %55, %cst_24 [0] : vector<16x1xf32> to vector<1xf32>
    %57 = vector.shape_cast %56 : vector<1xf32> to vector<1x1xf32>
    %cst_25 = arith.constant 6.250000e-02 : f32
    %58 = vector.broadcast %cst_25 : f32 to vector<1x1xf32>
    %59 = arith.mulf %57, %58 : vector<1x1xf32>
    %60 = arith.subf %49, %40 : vector<16x10xf32>
    %cst_26 = arith.constant 6.250000e-02 : f32
    %61 = vector.broadcast %cst_26 : f32 to vector<16x10xf32>
    %62 = arith.mulf %60, %61 : vector<16x10xf32>
    %63 = arith.truncf %62 : vector<16x10xf32> to vector<16x10xbf16>
    %cst_27 = arith.constant dense<0.000000e+00> : vector<10x32xf32>
    %64 = tpu.matmul %63, %21, %cst_27 {dimension_numbers = #tpu.dot_dimension_numbers<[0], [0], [1], [1], [0, 1, 1, 1], [], []>} : vector<16x10xbf16>, vector<16x32xbf16>, vector<10x32xf32> -> vector<10x32xf32>
    %cst_28 = arith.constant dense<0.000000e+00> : vector<10xf32>
    %65 = vector.multi_reduction <add>, %62, %cst_28 [0] : vector<16x10xf32> to vector<10xf32>
    %66 = vector.shape_cast %65 : vector<10xf32> to vector<1x10xf32>
    %cst_29 = arith.constant dense<0.000000e+00> : vector<16x32xf32>
    %67 = tpu.matmul %63, %7, %cst_29 {dimension_numbers = #tpu.dot_dimension_numbers<[1], [0], [0], [1], [0, 0, 1, 1], [], []>} : vector<16x10xbf16>, vector<10x32xbf16>, vector<16x32xf32> -> vector<16x32xf32>
    %cst_30 = arith.constant 0.000000e+00 : f32
    %68 = vector.broadcast %cst_30 : f32 to vector<16x32xf32>
    %69 = arith.cmpf ogt, %20, %68 : vector<16x32xf32>
    %cst_31 = arith.constant 0.000000e+00 : f32
    %70 = vector.broadcast %cst_31 : f32 to vector<16x32xf32>
    %71 = arith.select %69, %67, %70 : vector<16x32xi1>, vector<16x32xf32>
    %72 = arith.truncf %71 : vector<16x32xf32> to vector<16x32xbf16>
    %cst_32 = arith.constant dense<0.000000e+00> : vector<32x64xf32>
    %73 = tpu.matmul %72, %14, %cst_32 {dimension_numbers = #tpu.dot_dimension_numbers<[0], [0], [1], [1], [0, 1, 1, 1], [], []>} : vector<16x32xbf16>, vector<16x64xbf16>, vector<32x64xf32> -> vector<32x64xf32>
    %cst_33 = arith.constant dense<0.000000e+00> : vector<32xf32>
    %74 = vector.multi_reduction <add>, %71, %cst_33 [0] : vector<16x32xf32> to vector<32xf32>
    %75 = vector.shape_cast %74 : vector<32xf32> to vector<1x32xf32>
    %cst_34 = arith.constant dense<0.000000e+00> : vector<16x64xf32>
    %76 = tpu.matmul %72, %5, %cst_34 {dimension_numbers = #tpu.dot_dimension_numbers<[1], [0], [0], [1], [0, 0, 1, 1], [], []>} : vector<16x32xbf16>, vector<32x64xbf16>, vector<16x64xf32> -> vector<16x64xf32>
    %cst_35 = arith.constant 0.000000e+00 : f32
    %77 = vector.broadcast %cst_35 : f32 to vector<16x64xf32>
    %78 = arith.cmpf ogt, %13, %77 : vector<16x64xf32>
    %cst_36 = arith.constant 0.000000e+00 : f32
    %79 = vector.broadcast %cst_36 : f32 to vector<16x64xf32>
    %80 = arith.select %78, %76, %79 : vector<16x64xi1>, vector<16x64xf32>
    %81 = arith.truncf %80 : vector<16x64xf32> to vector<16x64xbf16>
    %cst_37 = arith.constant dense<0.000000e+00> : vector<64x256xf32>
    %82 = tpu.matmul %81, %1, %cst_37 {dimension_numbers = #tpu.dot_dimension_numbers<[0], [0], [1], [1], [0, 1, 1, 1], [], []>} : vector<16x64xbf16>, vector<16x256xbf16>, vector<64x256xf32> -> vector<64x256xf32>
    %cst_38 = arith.constant dense<0.000000e+00> : vector<64xf32>
    %83 = vector.multi_reduction <add>, %80, %cst_38 [0] : vector<16x64xf32> to vector<64xf32>
    %84 = vector.shape_cast %83 : vector<64xf32> to vector<1x64xf32>
    %85 = arith.mulf %82, %82 : vector<64x256xf32>
    %cst_39 = arith.constant dense<0.000000e+00> : vector<64xf32>
    %86 = vector.multi_reduction <add>, %85, %cst_39 [1] : vector<64x256xf32> to vector<64xf32>
    %87 = vector.shape_cast %86 : vector<64xf32> to vector<64x1xf32>
    %cst_40 = arith.constant dense<0.000000e+00> : vector<1xf32>
    %88 = vector.multi_reduction <add>, %87, %cst_40 [0] : vector<64x1xf32> to vector<1xf32>
    %89 = vector.shape_cast %88 : vector<1xf32> to vector<1x1xf32>
    %90 = arith.mulf %84, %84 : vector<1x64xf32>
    %cst_41 = arith.constant dense<0.000000e+00> : vector<1xf32>
    %91 = vector.multi_reduction <add>, %90, %cst_41 [1] : vector<1x64xf32> to vector<1xf32>
    %92 = vector.shape_cast %91 : vector<1xf32> to vector<1x1xf32>
    %cst_42 = arith.constant dense<0.000000e+00> : vector<1xf32>
    %93 = vector.multi_reduction <add>, %92, %cst_42 [0] : vector<1x1xf32> to vector<1xf32>
    %94 = vector.shape_cast %93 : vector<1xf32> to vector<1x1xf32>
    %95 = arith.mulf %73, %73 : vector<32x64xf32>
    %cst_43 = arith.constant dense<0.000000e+00> : vector<32xf32>
    %96 = vector.multi_reduction <add>, %95, %cst_43 [1] : vector<32x64xf32> to vector<32xf32>
    %97 = vector.shape_cast %96 : vector<32xf32> to vector<32x1xf32>
    %cst_44 = arith.constant dense<0.000000e+00> : vector<1xf32>
    %98 = vector.multi_reduction <add>, %97, %cst_44 [0] : vector<32x1xf32> to vector<1xf32>
    %99 = vector.shape_cast %98 : vector<1xf32> to vector<1x1xf32>
    %100 = arith.mulf %75, %75 : vector<1x32xf32>
    %cst_45 = arith.constant dense<0.000000e+00> : vector<1xf32>
    %101 = vector.multi_reduction <add>, %100, %cst_45 [1] : vector<1x32xf32> to vector<1xf32>
    %102 = vector.shape_cast %101 : vector<1xf32> to vector<1x1xf32>
    %cst_46 = arith.constant dense<0.000000e+00> : vector<1xf32>
    %103 = vector.multi_reduction <add>, %102, %cst_46 [0] : vector<1x1xf32> to vector<1xf32>
    %104 = vector.shape_cast %103 : vector<1xf32> to vector<1x1xf32>
    %105 = arith.mulf %64, %64 : vector<10x32xf32>
    %cst_47 = arith.constant dense<0.000000e+00> : vector<10xf32>
    %106 = vector.multi_reduction <add>, %105, %cst_47 [1] : vector<10x32xf32> to vector<10xf32>
    %107 = vector.shape_cast %106 : vector<10xf32> to vector<10x1xf32>
    %cst_48 = arith.constant dense<0.000000e+00> : vector<1xf32>
    %108 = vector.multi_reduction <add>, %107, %cst_48 [0] : vector<10x1xf32> to vector<1xf32>
    %109 = vector.shape_cast %108 : vector<1xf32> to vector<1x1xf32>
    %110 = arith.mulf %66, %66 : vector<1x10xf32>
    %cst_49 = arith.constant dense<0.000000e+00> : vector<1xf32>
    %111 = vector.multi_reduction <add>, %110, %cst_49 [1] : vector<1x10xf32> to vector<1xf32>
    %112 = vector.shape_cast %111 : vector<1xf32> to vector<1x1xf32>
    %cst_50 = arith.constant dense<0.000000e+00> : vector<1xf32>
    %113 = vector.multi_reduction <add>, %112, %cst_50 [0] : vector<1x1xf32> to vector<1xf32>
    %114 = vector.shape_cast %113 : vector<1xf32> to vector<1x1xf32>
    %115 = tpu.iota {dimensions = array<i32: 1>} : vector<1x8xi32>
    %cst_51 = arith.constant 0.000000e+00 : f32
    %116 = vector.broadcast %cst_51 : f32 to vector<1x8xf32>
    %c0_i32 = arith.constant 0 : i32
    %117 = vector.broadcast %c0_i32 : i32 to vector<1x8xi32>
    %118 = arith.cmpi eq, %115, %117 : vector<1x8xi32>
    %119 = vector.shape_cast %89 : vector<1x1xf32> to vector<1x1xf32>
    %120 = vector.broadcast %119 : vector<1x1xf32> to vector<1x8xf32>
    %121 = arith.select %118, %120, %116 : vector<1x8xi1>, vector<1x8xf32>
    %c1_i32 = arith.constant 1 : i32
    %122 = vector.broadcast %c1_i32 : i32 to vector<1x8xi32>
    %123 = arith.cmpi eq, %115, %122 : vector<1x8xi32>
    %124 = vector.shape_cast %94 : vector<1x1xf32> to vector<1x1xf32>
    %125 = vector.broadcast %124 : vector<1x1xf32> to vector<1x8xf32>
    %126 = arith.select %123, %125, %121 : vector<1x8xi1>, vector<1x8xf32>
    %c2_i32 = arith.constant 2 : i32
    %127 = vector.broadcast %c2_i32 : i32 to vector<1x8xi32>
    %128 = arith.cmpi eq, %115, %127 : vector<1x8xi32>
    %129 = vector.shape_cast %99 : vector<1x1xf32> to vector<1x1xf32>
    %130 = vector.broadcast %129 : vector<1x1xf32> to vector<1x8xf32>
    %131 = arith.select %128, %130, %126 : vector<1x8xi1>, vector<1x8xf32>
    %c3_i32 = arith.constant 3 : i32
    %132 = vector.broadcast %c3_i32 : i32 to vector<1x8xi32>
    %133 = arith.cmpi eq, %115, %132 : vector<1x8xi32>
    %134 = vector.shape_cast %104 : vector<1x1xf32> to vector<1x1xf32>
    %135 = vector.broadcast %134 : vector<1x1xf32> to vector<1x8xf32>
    %136 = arith.select %133, %135, %131 : vector<1x8xi1>, vector<1x8xf32>
    %c4_i32 = arith.constant 4 : i32
    %137 = vector.broadcast %c4_i32 : i32 to vector<1x8xi32>
    %138 = arith.cmpi eq, %115, %137 : vector<1x8xi32>
    %139 = vector.shape_cast %109 : vector<1x1xf32> to vector<1x1xf32>
    %140 = vector.broadcast %139 : vector<1x1xf32> to vector<1x8xf32>
    %141 = arith.select %138, %140, %136 : vector<1x8xi1>, vector<1x8xf32>
    %c5_i32 = arith.constant 5 : i32
    %142 = vector.broadcast %c5_i32 : i32 to vector<1x8xi32>
    %143 = arith.cmpi eq, %115, %142 : vector<1x8xi32>
    %144 = vector.shape_cast %114 : vector<1x1xf32> to vector<1x1xf32>
    %145 = vector.broadcast %144 : vector<1x1xf32> to vector<1x8xf32>
    %146 = arith.select %143, %145, %141 : vector<1x8xi1>, vector<1x8xf32>
    %c6_i32 = arith.constant 6 : i32
    %147 = vector.broadcast %c6_i32 : i32 to vector<1x8xi32>
    %148 = arith.cmpi eq, %115, %147 : vector<1x8xi32>
    %149 = vector.shape_cast %59 : vector<1x1xf32> to vector<1x1xf32>
    %150 = vector.broadcast %149 : vector<1x1xf32> to vector<1x8xf32>
    %151 = arith.select %148, %150, %146 : vector<1x8xi1>, vector<1x8xf32>
    %c0_52 = arith.constant 0 : index
    %c0_53 = arith.constant 0 : index
    %152 = vector.load %arg8[%c0_52, %c0_53] : memref<1x8xf32, #tpu.memory_space<vmem>>, vector<1x8xf32>
    tpu.vector_store %arg8[%c0_52, %c0_53], %151 {strides = array<i32>} : memref<1x8xf32, #tpu.memory_space<vmem>>, vector<1x8xf32>,
    return
  }
}

</mosaic_0001>

<bundles_post_ra>
// kernel: trace_fim_step.1
= control target key start
LH: loop header
LB: loop body
LE: loop exit
PB: predicated region body
PF: predicated region fallthrough
CT: control target
= control target key end

     0   :  { %v954_v7 = vmov 0.0   ;;  %s1279_s0 = inlined_call_operand.vmem [shape: f32[16,256], index: 0, kind: input, shape index: {}]   ;;  %s1280_s1 = inlined_call_operand.vmem [shape: f32[64,256], index: 1, kind: input, shape index: {}]   ;;  %s1281_s2 = inlined_call_operand.vmem [shape: f32[1,64], index: 2, kind: input, shape index: {}]   ;;  %s1282_s3 = inlined_call_operand.vmem [shape: f32[32,64], index: 3, kind: input, shape index: {}]   ;;  %s1283_s4 = inlined_call_operand.vmem [shape: f32[1,32], index: 4, kind: input, shape index: {}]   ;;  %s1284_s5 = inlined_call_operand.vmem [shape: f32[10,32], index: 5, kind: input, shape index: {}]   ;;  %s1285_s6 = inlined_call_operand.vmem [shape: f32[1,10], index: 6, kind: input, shape index: {}]   ;;  %s1286_s7 = inlined_call_operand.vmem [shape: f32[16,10], index: 7, kind: input, shape index: {}]   ;;  %s1287_s8 = inlined_call_operand.hbm [shape: f32[1,8], index: 8, kind: output, shape index: {}]  }
   0x1   :  { %v38_v0 = vld [vmem:[%s1280_s1 + $0x8] sm:$0xff]  ;;  %v40_v1 = vld [vmem:[%s1280_s1 + $0x18] sm:$0xff]  ;;  %v37_v2 = vld [vmem:[%s1280_s1] sm:$0xff]  ;;  %882 = vmatprep.subr.bf16.mxu1 %v954_v7 }
   0x2   :  { %v54_v3 = vpack.c.bf16 %v40_v1, %v38_v0  ;;  %v39_v4 = vld [vmem:[%s1280_s1 + $0x10] sm:$0xff]  ;;  %v42_v5 = vld [vmem:[%s1280_s1 + $0x28] sm:$0xff]  ;;  %v44_v6 = vld [vmem:[%s1280_s1 + $0x38] sm:$0xff] }
   0x3   :  { %v53_v8 = vpack.c.bf16 %v39_v4, %v37_v2  ;;  %v56_v9 = vpack.c.bf16 %v44_v6, %v42_v5  ;;  %v41_v10 = vld [vmem:[%s1280_s1 + $0x20] sm:$0xff]  ;;  %v43_v11 = vld [vmem:[%s1280_s1 + $0x30] sm:$0xff]  ;;  %v32_v12 = vld [vmem:[%s1279_s0 + $0x8] sm:$0xff] }
   0x4   :  { %77 = vmatprep.subr.bf16.mxu0 %v54_v3  ;;  %v34_v13 = vld [vmem:[%s1279_s0 + $0x18] sm:$0xff]  ;;  %v46_v14 = vld [vmem:[%s1280_s1 + $0x48] sm:$0xff] }
   0x5   :  { %78 = vmatpush1.bf16.xpose.msra.mxu0 %v53_v8  ;;  %v48_v15 = vld [vmem:[%s1280_s1 + $0x58] sm:$0xff]  ;;  %v1040_v16 = vpack.c.bf16 %v34_v13, %v32_v12 }
   0x6   :  { %79 = vmatprep.subr.bf16.mxu0 %v56_v9 }
   0x7   :  { %13 = vsyncpa [#allocation3], 0  ;;  %v55_v17 = vpack.c.bf16 %v43_v11, %v41_v10  ;;  %109 = vmatprep.mubr.bf16.mxu0 %v1040_v16  ;;  %v58_v18 = vpack.c.bf16 %v48_v15, %v46_v14  ;;  %v45_v19 = vld [vmem:[%s1280_s1 + $0x40] sm:$0xff]  ;;  %v47_v20 = vld [vmem:[%s1280_s1 + $0x50] sm:$0xff]  ;;  %vm128_vm0 = vcmask 523264   ;;  %vm955_vm1 = vmmov 0  }
   0x8   :  { %v50_v21 = vld [vmem:[%s1280_s1 + $0x68] sm:$0xff]  ;;  %v52_v22 = vld [vmem:[%s1280_s1 + $0x78] sm:$0xff]  ;;  %v57_v23 = vpack.c.bf16 %v47_v20, %v45_v19  ;;  %v49_v25 = vld [vmem:[%s1280_s1 + $0x60] sm:$0xff]  ;;  %884 = vmatprep.mubr.msk.bf16.mxu1 %vm955_vm1, %v954_v7  ;;  %vm189_vm2 = vcmask 261120   ;;  %vm243_vm3 = vcmask 80896   ;;  %v237_v15 = vlaneseq }
   0x9   :  { %v60_v24 = vpack.c.bf16 %v52_v22, %v50_v21  ;;  %v51_v26 = vld [vmem:[%s1280_s1 + $0x70] sm:$0xff]  ;;  %v61_v28 = vld [vmem:[%s1282_s3] sm:$0xff]  ;;  %v62_v29 = vld [vmem:[%s1282_s3 + $0x8] sm:$0xff]  ;;  %vm414_vm8 = vcmask 1044480   ;;  %vm357_vm11 = vcmask 130048  }
   0xa   :  { %v59_v27 = vpack.c.bf16 %v51_v26, %v49_v25  ;;  %v31_v30 = vld [vmem:[%s1279_s0] sm:$0xff]  ;;  %v33_v31 = vld [vmem:[%s1279_s0 + $0x10] sm:$0xff]  ;;  %v1074_v32 = vpack.c.bf16 %v62_v29, %v61_v28  ;;  %v64_v36 = vld [vmem:[%s1282_s3 + $0x18] sm:$0xff] }
   0xb   :  { %v1076_v33 = vpack.c.bf16 %v33_v31, %v31_v30  ;;  %v63_v35 = vld [vmem:[%s1282_s3 + $0x10] sm:$0xff]  ;;  %v843_v39 = vld [vmem:[%s1281_s2] ss:$0 sm:$0xff]  ;;  %v68_v50 = vld [vmem:[%s1284_s5 + $0x8] sm:$0x3] }
   0xc   :  { %v133_v34 = vsel %vm128_vm0, %v1074_v32, 0  ;;  %v1088_v37 = vpack.c.bf16 %v64_v36, %v63_v35  ;;  %v67_v49 = vld [vmem:[%s1284_s5] sm:$0xff]  ;;  %v240_v5 = vld [vmem:[%s1286_s7 + $0x8] sm:$0xff] }
   0xd   :  { %80 = vmatpush1.bf16.xpose.msra.mxu0 %v55_v17  ;;  %v1122_v51 = vpack.c.bf16 %v68_v50, %v67_v49  ;;  %v844_v53 = vld [vmem:[%s1283_s4] ss:$0 sm:$0xff] }
   0xe   :  { %81 = vmatprep.subr.bf16.mxu0 %v58_v18  ;;  %v136_v38 = vsel %vm128_vm0, %v1088_v37, 0  ;;  %v846_v63 = vld [vmem:[%s1285_s6] ss:$0 sm:$0xff]  ;;  %v1167_v18 = vand.u32 127, %v237_v15  ;;  %s957_s6 = smov [#allocation2]  }
   0xf   :  { %v194_v52 = vsel %vm189_vm2, %v1122_v51, 0  ;;  %v239_v1 = vld [vmem:[%s1286_s7] sm:$0xff]  ;;  %s835_s7 = sshll.u32 %s957_s6, 4  ;;  %s836_s7 = int_to_ptr.vmem [resolvable:$true] %s835_s7 }
  0x10   :  { %883 = vmatpush3.bf16.xpose.msra.mxu1 %v194_v52  ;;  %s930_s17 = scalar_lea.vmem %s836_s7, 16  ;;  %s934_s18 = scalar_lea.vmem %s836_s7, 32 }
  0x11   :  { %888 = vmatprep.subr.bf16.mxu1 %v954_v7  ;;  %p931_p0 = scmp.ne.s32.totalorder %s836_s7, %s930_s17  ;;  %p935_p1 = scmp.lt.s32.totalorder %s836_s7, %s836_s7 }
  0x12   :  { %p936_p2 = scmp.lt.s32.totalorder %s934_s18, %s930_s17 }
  0x14   :  { %p937_p3 = por %p936_p2, %p935_p1 }
  0x15   :  { %82 = vmatpush1.bf16.xpose.msra.mxu0 %v57_v23 }
  0x16   :  { %83 = vmatprep.subr.bf16.mxu0 %v60_v24  ;;  %p938_p4 = pnand %p937_p3, %p931_p0 }
  0x1d   :  { %84 = vmatpush1.bf16.xpose.msra.mxu0 %v59_v27 }
  0x1e   :  { %874 = vmatprep.subr.bf16.mxu0 %v954_v7 }
  0x24   :  { %110 = vmatmul.mubr.bf16.vlgmr.msra.gmra.mrb[0].mxu0 %v1076_v33 }
  0x25   :  { %875 = vmatpush3.bf16.xpose.msra.mxu0 %v133_v34  ;;  %878 = vmatprep.mubr.msk.bf16.mxu0 %vm955_vm1, %v954_v7 }
  0x26   :  { %876 = vmatprep.subr.bf16.mxu0 %v954_v7 }
  0x2d   :  { %877 = vmatpush3.bf16.xpose.msra.mxu0 %v136_v38 }
  0x2e   :  { %894 = vmatprep.subr.bf16.mxu0 %v954_v7 }
  0xf7   :  { %v111_v40 = vpop.f32.mrb[0].mxu0 }
  0xf8   :  { %v1100_v41 = vadd.f32 %v843_v39, %v111_v40  ;;  %v113_v42 = vpop.f32.mrb[1].mxu0 }
  0xf9   :  { %v114_v43 = vpop.f32.mrb[2].mxu0 }
  0xfa   :  { %v1102_v44 = vadd.f32 %v843_v39, %v114_v43  ;;  %v116_v45 = vpop.f32.mrb[3].mxu0  ;;  %v118_v46 = vmax.f32 %v1100_v41, 0.0 }
  0xfc   :  { %v119_v47 = vmax.f32 %v1102_v44, 0.0  ;;  %vm587_vm14 = vcmp.gt.f32.partialorder %v118_v46, 0.0 }
  0xfe   :  { %v1110_v48 = vpack.c.bf16 %v119_v47, %v118_v46  ;;  %vm588_vm15 = vcmp.gt.f32.partialorder %v119_v47, 0.0 }
 0x100   :  { %879 = vmatmul.mubr.msk.bf16.vlgmr.msra.gmra.mrb[4].mxu0 %vm128_vm0, %v1110_v48 }
 0x101   :  { %896 = vmatprep.mubr.msk.bf16.mxu0 %vm955_vm1, %v954_v7 }
 0x1d3   :  { %v172_v54 = vpop.f32.mrb[4].mxu0 }
 0x1d4   :  { %v1130_v55 = vadd.f32 %v844_v53, %v172_v54  ;;  %v880_v56 = vpop.f32.mrb[5].mxu0 }
 0x1d5   :  { %v175_v57 = vpop.f32.mrb[6].mxu0  ;;  %v415_v56 = vsel %vm414_vm8, %v1122_v51, 0  ;;  %vm825_vm8 = vcmp.eq.s32.totalorder %v1167_v18, 6 }
 0x1d6   :  { %v1132_v58 = vadd.f32 %v844_v53, %v175_v57  ;;  %v881_v59 = vpop.f32.mrb[7].mxu0  ;;  %v179_v60 = vmax.f32 %v1130_v55, 0.0  ;;  %895 = vmatpush3.bf16.msra.mxu0 %v415_v56 }
 0x1d7   :  { %906 = vmatprep.subr.bf16.mxu0 %v954_v7 }
 0x1d8   :  { %v180_v61 = vmax.f32 %v1132_v58, 0.0  ;;  %vm458_vm12 = vcmp.gt.f32.partialorder %v179_v60, 0.0  ;;  %v956_v58 = vmov 0  }
 0x1da   :  { %v181_v62 = vpack.c.bf16 %v180_v61, %v179_v60  ;;  %vm459_vm13 = vcmp.gt.f32.partialorder %v180_v61, 0.0 }
 0x1dc   :  { %885 = vmatmul.mubr.msk.bf16.vlgmr.msra.gmra.mrb[0].mxu1 %vm189_vm2, %v181_v62 }
 0x1dd   :  { %889 = vmatpush3.bf16.msra.mxu1 %v181_v62  ;;  %890 = vmatprep.mubr.msk.bf16.mxu1 %vm955_vm1, %v954_v7 }
 0x1de   :  { %900 = vmatprep.subr.bf16.mxu1 %v1110_v48 }
 0x2af   :  { %v230_v0 = vpop.f32.mrb[0].mxu1 }
 0x2b0   :  { %v1150_v2 = vadd.f32 %v846_v63, %v230_v0  ;;  %v886_v3 = vpop.f32.mrb[1].mxu1 }
 0x2b1   :  { %v233_v4 = vpop.f32.mrb[2].mxu1 }
 0x2b2   :  { %v1155_v6 = vadd.f32 %v846_v63, %v233_v4  ;;  %v887_v8 = vpop.f32.mrb[3].mxu1  ;;  %v290_v9 = vsel %vm243_vm3, %v1150_v2, -inf  ;;  %v241_v10 = vadd.f32 %v239_v1, %v1150_v2 }
 0x2b3   :  { %291 = vmax.xlane.f32.xlu1 %v290_v9 }
 0x2b4   :  { %v244_v11 = vsel %vm243_vm3, %v241_v10, -inf  ;;  %v242_v12 = vadd.f32 %v240_v5, %v1155_v6  ;;  %v293_v13 = vsel %vm243_vm3, %v1155_v6, -inf }
 0x2b5   :  { %245 = vmax.xlane.f32.xlu0 %v244_v11 }
 0x2b6   :  { %v247_v14 = vsel %vm243_vm3, %v242_v12, -inf }
 0x2b7   :  { %294 = vmax.xlane.f32.xlu1 %v293_v13 }
 0x2b9   :  { %248 = vmax.xlane.f32.xlu0 %v247_v14 }
 0x340   :  { %v1165_v17 = vpop.xlane.xlu1 %291 }
 0x341   :  { %v296_v19 = vsub.f32 %v1150_v2, %v1165_v17 }
 0x342   :  { %v246_v20 = vpop.xlane.xlu0 %245 }
 0x343   :  { %v298_v21 = vmul.f32 1.442695, %v296_v19  ;;  %vm250_vm4 = vcmp.eq.f32.partialorder %v241_v10, %v246_v20 }
 0x344   :  { %v252_v22 = vsel %vm250_vm4, %v1167_v18, 10  ;;  %v1172_v23 = vpop.xlane.xlu1 %294  ;;  %vm817_vm4 = vcmp.eq.s32.totalorder %v1167_v18, 2 }
 0x345   :  { %918 = vpow2.f32 %v298_v21  ;;  %v254_v24 = vsel %vm243_vm3, %v252_v22, 2147483647  ;;  %v297_v25 = vsub.f32 %v1155_v6, %v1172_v23 }
 0x346   :  { %v249_v26 = vpop.xlane.xlu0 %248  ;;  %v256_v27 = vshra.s32 %v254_v24, 16  ;;  %v255_v42 = vand.u32 65535, %v254_v24 }
 0x347   :  { %v300_v28 = vmul.f32 1.442695, %v297_v25  ;;  %vm251_vm5 = vcmp.eq.f32.partialorder %v242_v12, %v249_v26 }
 0x348   :  { %v253_v29 = vsel %vm251_vm5, %v1167_v18, 10  ;;  %v258_v30 = vcvt.s32.f32 %v256_v27  ;;  %v257_v45 = vcvt.s32.f32 %v255_v42  ;;  %vm819_vm5 = vcmp.eq.s32.totalorder %v1167_v18, 3 }
 0x349   :  { %920 = vpow2.f32 %v300_v28  ;;  %v269_v31 = vsel %vm243_vm3, %v253_v29, 2147483647 }
 0x34a   :  { %259 = vmin.xlane.f32.xlu0 %v258_v30  ;;  %v271_v34 = vshra.s32 %v269_v31, 16  ;;  %v270_v49 = vand.u32 65535, %v269_v31 }
 0x34c   :  { %v273_v35 = vcvt.s32.f32 %v271_v34  ;;  %v272_v53 = vcvt.s32.f32 %v270_v49 }
 0x34e   :  { %274 = vmin.xlane.f32.xlu1 %v273_v35 }
 0x34f   :  { %v919_v36 = vpop.eup %918 }
 0x350   :  { %v302_v38 = vsel %vm243_vm3, %v919_v36, 0.0 }
 0x351   :  { %303 = vadd.xlane.f32.xlu0 %v302_v38 }
 0x353   :  { %v921_v39 = vpop.eup %920 }
 0x354   :  { %v305_v40 = vsel %vm243_vm3, %v921_v39, 0.0 }
 0x355   :  { %306 = vadd.xlane.f32.xlu1 %v305_v40 }
 0x3d7   :  { %v260_v43 = vpop.xlane.xlu0 %259 }
 0x3d8   :  { %vm261_vm6 = vcmp.eq.f32.partialorder %v258_v30, %v260_v43  ;;  %v266_v62 = vcvt.f32.s32 %v260_v43 }
 0x3d9   :  { %v262_v50 = vsel %vm261_vm6, %v257_v45, inf  ;;  %vm821_vm6 = vcmp.eq.s32.totalorder %v1167_v18, 4 }
 0x3da   :  { %263 = vmin.xlane.f32.xlu0 %v262_v50  ;;  %v267_v0 = vshll.u32 %v266_v62, 16 }
 0x3db   :  { %v275_v52 = vpop.xlane.xlu1 %274 }
 0x3dc   :  { %vm276_vm7 = vcmp.eq.f32.partialorder %v273_v35, %v275_v52  ;;  %v281_v1 = vcvt.f32.s32 %v275_v52 }
 0x3dd   :  { %v277_v54 = vsel %vm276_vm7, %v272_v53, inf  ;;  %vm823_vm7 = vcmp.eq.s32.totalorder %v1167_v18, 5 }
 0x3de   :  { %278 = vmin.xlane.f32.xlu1 %v277_v54  ;;  %v1183_v57 = vpop.xlane.xlu0 %303  ;;  %v282_v51 = vshll.u32 %v281_v1, 16 }
 0x3df   :  { %922 = vrcp.f32 %v1183_v57 }
 0x3e2   :  { %v1186_v59 = vpop.xlane.xlu1 %306 }
 0x3e3   :  { %924 = vrcp.f32 %v1186_v59 }
 0x3e4   :  { %926 = vlog2.f32 %v1183_v57 }
 0x3e5   :  { %928 = vlog2.f32 %v1186_v59 }
 0x3e9   :  { %v923_v4 = vpop.eup %922 }
 0x3ea   :  { %v309_v10 = vmul.f32 %v923_v4, %v919_v36 }
 0x3ed   :  { %v925_v11 = vpop.eup %924 }
 0x3ee   :  { %v311_v15 = vmul.f32 %v925_v11, %v921_v39 }
 0x467   :  { %v264_v63 = vpop.xlane.xlu0 %263 }
 0x468   :  { %v265_v3 = vcvt.f32.s32 %v264_v63 }
 0x46a   :  { %v268_v5 = vadd.s32 %v267_v0, %v265_v3 }
 0x46b   :  { %v279_v8 = vpop.xlane.xlu1 %278 }
 0x46c   :  { %vm284_vm9 = vcmp.eq.s32.totalorder %v1167_v18, %v268_v5  ;;  %v280_v9 = vcvt.f32.s32 %v279_v8 }
 0x46d   :  { %v848_v12 = vsel %vm284_vm9, 1.0, %v954_v7  ;;  %vm827_vm9 = vcmask 57344  }
 0x46e   :  { %v283_v13 = vadd.s32 %v282_v51, %v280_v9  ;;  %v336_v14 = vsub.f32 %v309_v10, %v848_v12  ;;  %v318_v50 = vmul.f32 %v848_v12, %v1150_v2 }
 0x470   :  { %vm285_vm10 = vcmp.eq.s32.totalorder %v1167_v18, %v283_v13  ;;  %v338_v21 = vmul.f32 0.0625, %v336_v14  ;;  %v320_v41 = vsel %vm243_vm3, %v318_v50, 0.0 }
 0x471   :  { %v1193_v19 = vsel %vm285_vm10, 1.0, %v954_v7 }
 0x472   :  { %v337_v20 = vsub.f32 %v311_v15, %v1193_v19  ;;  %v402_v25 = vsel %vm243_vm3, %v338_v21, 0.0 }
 0x474   :  { %v339_v22 = vmul.f32 0.0625, %v337_v20 }
 0x476   :  { %v340_v24 = vpack.c.bf16 %v339_v22, %v338_v21  ;;  %v403_v26 = vsel %vm243_vm3, %v339_v22, 0.0 }
 0x477   :  { %v1198_v27 = vadd.f32 %v403_v26, %v402_v25 }
 0x478   :  { %341 = vxpose.xlu0.c.b16.start.end [1/1] (short) (narrow) %v340_v24, 16  ;;  %897 = vmatmul.mubr.msk.bf16.vlgmr.msra.gmra.mrb[8].mxu0 %vm243_vm3, %v340_v24 }
 0x479   :  { %907 = vmatpush3.bf16.msra.mxu0 %v1074_v32  ;;  %910 = vmatprep.mubr.msk.bf16.mxu0 %vm955_vm1, %v954_v7  ;;  %vm795_vm1 = vcmask 254976  }
 0x47a   :  { %908 = vmatprep.subr.bf16.mxu0 %v954_v7 }
 0x47d   :  { %909 = vmatpush3.bf16.msra.mxu0 %v1088_v37 }
 0x4de   :  { %v349_v28 = vpop.trf.xlu0 }
 0x4df   :  { %891 = vmatmul.mubr.msk.bf16.vlgmr.msra.gmra.mrb[4].mxu1 %vm357_vm11, %v349_v28 }
 0x4e0   :  { %901 = vmatpush3.bf16.msra.mxu1 %v1110_v48 }
 0x4e1   :  { %620 = vmatprep.subr.bf16.mxu1 %v1040_v16 }
 0x54b   :  { %v451_v29 = vpop.f32.mrb[8].mxu0 }
 0x54c   :  { %v460_v32 = vsel %vm458_vm12, %v451_v29, 0.0  ;;  %v898_v30 = vpop.f32.mrb[9].mxu0 }
 0x54d   :  { %v454_v31 = vpop.f32.mrb[10].mxu0  ;;  %v534_v34 = vsel %vm189_vm2, %v460_v32, 0.0 }
 0x54e   :  { %v461_v7 = vsel %vm459_vm13, %v454_v31, 0.0  ;;  %v899_v37 = vpop.f32.mrb[11].mxu0 }
 0x54f   :  { %v535_v35 = vsel %vm189_vm2, %v461_v7, 0.0  ;;  %v462_v36 = vpack.c.bf16 %v461_v7, %v460_v32 }
 0x550   :  { %v1215_v48 = vadd.f32 %v535_v35, %v534_v34 }
 0x551   :  { %463 = vxpose.xlu1.c.b16.start.end [1/1] (short) (narrow) %v462_v36, 32  ;;  %911 = vmatmul.mubr.msk.bf16.vlgmr.msra.gmra.mrb[12].mxu0 %vm189_vm2, %v462_v36 }
 0x552   :  { %v537_v30 = vrot.slane %v1215_v48, 4 }
 0x5b2   :  { %v1229_v46 = vpop.f32.mrb[4].mxu1 }
 0x5b3   :  { %v892_v52 = vpop.f32.mrb[5].mxu1 }
 0x5b4   :  { %v1231_v53 = vpop.f32.mrb[6].mxu1 }
 0x5b5   :  { %v893_v44 = vpop.f32.mrb[7].mxu1 }
 0x5b7   :  { %v471_v16 = vpop.trf.xlu1 }
 0x5b8   :  { %902 = vmatprep.mubr.msk.bf16.mxu1 %vm357_vm11, %v471_v16  ;;  %v538_v16 = vadd.f32 %v537_v30, %v1215_v48 }
 0x5bb   :  { %v472_v55 = vpop.trf.xlu1 }
 0x5bc   :  { %903 = vmatmul.mubr.msk.bf16.vlgmr.msra.gmra.mrb[8].mxu1 %vm357_vm11, %v472_v55 }
 0x5bd   :  { %621 = vmatpush1.bf16.msra.mxu1 %v1076_v33  ;;  %652 = vmatprep.mubr.bf16.mxu1 %v956_v58 }
 0x624   :  { %v580_v60 = vpop.f32.mrb[12].mxu0 }
 0x625   :  { %v589_v61 = vsel %vm587_vm14, %v580_v60, 0.0  ;;  %v912_v38 = vpop.f32.mrb[13].mxu0 }
 0x626   :  { %v583_v39 = vpop.f32.mrb[14].mxu0  ;;  %v693_v43 = vsel %vm128_vm0, %v589_v61, 0.0 }
 0x627   :  { %v590_v40 = vsel %vm588_vm15, %v583_v39, 0.0  ;;  %v913_v42 = vpop.f32.mrb[15].mxu0 }
 0x628   :  { %v694_v45 = vsel %vm128_vm0, %v590_v40, 0.0  ;;  %v591_v49 = vpack.c.bf16 %v590_v40, %v589_v61  ;;  %v539_v42 = vrot.slane %v538_v16, 2 }
 0x629   :  { %v695_v33 = vadd.f32 %v694_v45, %v693_v43 }
 0x62a   :  { %592 = vxpose.xlu0.c.b16.start.end [1/1] (short) (narrow) %v591_v49, 64 }
 0x62b   :  { %v696_v35 = vrot.slane %v695_v33, 4 }
 0x62d   :  { %v697_v60 = vadd.f32 %v696_v35, %v695_v33 }
 0x643   :  { %321 = vadd.xlane.f32.xlu0 %v320_v41  ;;  %v698_v41 = vrot.slane %v697_v60, 2 }
 0x68f   :  { %v904_v56 = vpop.f32.mrb[8].mxu1 }
 0x690   :  { %v600_v47 = vpop.trf.xlu0  ;;  %v762_v62 = vmul.f32 %v904_v56, %v904_v56  ;;  %v519_v2 = vpop.f32.mrb[9].mxu1 }
 0x691   :  { %855 = vmatmul.mubr.msk.bf16.vlgmr.msra.gmra.mrb[12].mxu1 %vm357_vm11, %v600_v47  ;;  %v760_v63 = vmul.f32 %v519_v2, %v519_v2  ;;  %v905_v0 = vpop.f32.mrb[10].mxu1  ;;  %v540_v47 = vadd.f32 %v539_v42, %v538_v16 }
 0x692   :  { %662 = vmatprep.mubr.bf16.mxu1 %v956_v58  ;;  %v770_v3 = vsel %vm128_vm0, %v762_v62, 0.0  ;;  %v522_v4 = vpop.f32.mrb[11].mxu1  ;;  %v763_v48 = vmul.f32 %v905_v0, %v905_v0  ;;  %v699_v62 = vadd.f32 %v698_v41, %v697_v60  ;;  %v319_v0 = vmul.f32 %v1193_v19, %v1155_v6 }
 0x693   :  { %771 = vadd.xlane.f32.xlu1 %v770_v3  ;;  %v761_v5 = vmul.f32 %v522_v4, %v522_v4  ;;  %v764_v8 = vsel %vm128_vm0, %v760_v63, 0.0 }
 0x694   :  { %v601_v54 = vpop.trf.xlu0  ;;  %765 = vadd.xlane.f32.xlu0 %v764_v8  ;;  %v541_v8 = vrot.slane %v540_v47, 1 }
 0x695   :  { %v767_v51 = vsel %vm128_vm0, %v761_v5, 0.0  ;;  %v773_v5 = vsel %vm128_vm0, %v763_v48, 0.0 }
 0x697   :  { %768 = vadd.xlane.f32.xlu1 %v767_v51 }
 0x698   :  { %v602_v1 = vpop.trf.xlu0 }
 0x699   :  { %856 = vmatmul.mubr.msk.bf16.gmra.mrb[16].mxu1 %vm357_vm11, %v601_v54 }
 0x69a   :  { %672 = vmatprep.mubr.bf16.mxu1 %v956_v58 }
 0x69c   :  { %v603_v9 = vpop.trf.xlu0 }
 0x6a1   :  { %857 = vmatmul.mubr.msk.bf16.gmra.mrb[20].mxu1 %vm357_vm11, %v602_v1 }
 0x6a2   :  { %682 = vmatprep.mubr.bf16.mxu1 %v956_v58  ;;  %v405_v58 = vrot.slane %v1198_v27, 4 }
 0x6a4   :  { %v406_v52 = vadd.f32 %v405_v58, %v1198_v27 }
 0x6a6   :  { %v407_v2 = vrot.slane %v406_v52, 2 }
 0x6a9   :  { %858 = vmatmul.mubr.msk.bf16.gmra.mrb[24].mxu1 %vm357_vm11, %v603_v9  ;;  %v700_v9 = vrot.slane %v699_v62, 1 }
 0x6d0   :  { %v322_v30 = vpop.xlane.xlu0 %321 }
 0x764   :  { %v654_v10 = vpop.f32.mrb[12].mxu1 }
 0x765   :  { %v702_v11 = vmul.f32 %v654_v10, %v654_v10  ;;  %v656_v12 = vpop.f32.mrb[13].mxu1  ;;  %v408_v10 = vadd.f32 %v407_v2, %v406_v52 }
 0x766   :  { %v703_v13 = vmul.f32 %v656_v12, %v656_v12  ;;  %v658_v14 = vpop.f32.mrb[14].mxu1  ;;  %v790_v12 = vmul.f32 %v1229_v46, %v1229_v46 }
 0x767   :  { %v704_v15 = vmul.f32 %v658_v14, %v658_v14  ;;  %v660_v20 = vpop.f32.mrb[15].mxu1  ;;  %v791_v14 = vmul.f32 %v1231_v53, %v1231_v53 }
 0x768   :  { %v705_v21 = vmul.f32 %v660_v20, %v660_v20  ;;  %v718_v22 = vadd.f32 %v703_v13, %v702_v11  ;;  %v542_v13 = vadd.f32 %v541_v8, %v540_v47  ;;  %v701_v20 = vadd.f32 %v700_v9, %v699_v62 }
 0x769   :  { %v792_v6 = vsel %vm189_vm2, %v790_v12, 0.0 }
 0x76a   :  { %719 = vadd.xlane.f32.xlu1 %v718_v22  ;;  %v721_v24 = vadd.f32 %v705_v21, %v704_v15  ;;  %v323_v15 = vsel %vm243_vm3, %v319_v0, 0.0  ;;  %v409_v21 = vrot.slane %v408_v10, 1  ;;  %v785_v19 = vmul.f32 %v542_v13, %v542_v13 }
 0x76b   :  { %v796_v22 = vsel %vm795_vm1, %v791_v14, 0.0 }
 0x76c   :  { %722 = vadd.xlane.f32.xlu0 %v721_v24  ;;  %v664_v25 = vpop.f32.mrb[16].mxu1  ;;  %v755_v24 = vmul.f32 %v701_v20, %v701_v20  ;;  %v786_v46 = vsel %vm189_vm2, %v785_v19, 0.0  ;;  %vm813_vm2 = vcmp.eq.s32.totalorder %v1167_v18, 0 }
 0x76d   :  { %v706_v26 = vmul.f32 %v664_v25, %v664_v25  ;;  %v666_v28 = vpop.f32.mrb[17].mxu1  ;;  %v410_v25 = vadd.f32 %v409_v21, %v408_v10 }
 0x76e   :  { %v707_v29 = vmul.f32 %v666_v28, %v666_v28  ;;  %v668_v32 = vpop.f32.mrb[18].mxu1 }
 0x76f   :  { %v708_v31 = vmul.f32 %v668_v32, %v668_v32  ;;  %v670_v7 = vpop.f32.mrb[19].mxu1  ;;  %v808_v53 = vmul.f32 %v410_v25, %v410_v25 }
 0x770   :  { %v709_v37 = vmul.f32 %v670_v7, %v670_v7  ;;  %v724_v34 = vadd.f32 %v707_v29, %v706_v26  ;;  %v756_v26 = vsel %vm128_vm0, %v755_v24, 0.0  ;;  %v772_v29 = vpop.xlane.xlu1 %771  ;;  %v766_v7 = vpop.xlane.xlu0 %765  ;;  %vm799_vm0 = vcmask 1041408  }
 0x771   :  { %v809_v28 = vsel %vm243_vm3, %v808_v53, 0.0  ;;  %vm815_vm3 = vcmp.eq.s32.totalorder %v1167_v18, 1 }
 0x772   :  { %725 = vadd.xlane.f32.xlu1 %v724_v34  ;;  %v727_v36 = vadd.f32 %v709_v37, %v708_v31 }
 0x774   :  { %v674_v55 = vpop.f32.mrb[20].mxu1  ;;  %v769_v32 = vpop.xlane.xlu1 %768 }
 0x775   :  { %v710_v61 = vmul.f32 %v674_v55, %v674_v55  ;;  %v676_v38 = vpop.f32.mrb[21].mxu1  ;;  %v776_v58 = vadd.f32 %v769_v32, %v766_v7 }
 0x776   :  { %v711_v39 = vmul.f32 %v676_v38, %v676_v38  ;;  %728 = vadd.xlane.f32.xlu1 %v727_v36  ;;  %v678_v40 = vpop.f32.mrb[22].mxu1  ;;  %v927_v38 = vpop.eup %926 }
 0x777   :  { %v712_v43 = vmul.f32 %v678_v40, %v678_v40  ;;  %v680_v45 = vpop.f32.mrb[23].mxu1  ;;  %v929_v40 = vpop.eup %928  ;;  %v777_v42 = vadd.f32 %v776_v58, %v772_v29 }
 0x778   :  { %v713_v49 = vmul.f32 %v680_v45, %v680_v45  ;;  %v730_v50 = vadd.f32 %v711_v39, %v710_v61  ;;  %v313_v45 = vmul.f32 0.6931472, %v927_v38  ;;  %v315_v41 = vmul.f32 0.6931472, %v929_v40 }
 0x77a   :  { %731 = vadd.xlane.f32.xlu1 %v730_v50  ;;  %v733_v44 = vadd.f32 %v713_v49, %v712_v43  ;;  %v316_v48 = vadd.f32 %v313_v45, %v1165_v17 }
 0x77c   :  { %734 = vadd.xlane.f32.xlu0 %v733_v44  ;;  %v684_v54 = vpop.f32.mrb[24].mxu1  ;;  %v326_v62 = vsub.f32 %v316_v48, %v322_v30 }
 0x77d   :  { %v714_v33 = vmul.f32 %v684_v54, %v684_v54  ;;  %v686_v56 = vpop.f32.mrb[25].mxu1 }
 0x77e   :  { %v715_v63 = vmul.f32 %v686_v56, %v686_v56  ;;  %v688_v1 = vpop.f32.mrb[26].mxu1 }
 0x77f   :  { %v716_v3 = vmul.f32 %v688_v1, %v688_v1  ;;  %v690_v4 = vpop.f32.mrb[27].mxu1 }
 0x780   :  { %v717_v51 = vmul.f32 %v690_v4, %v690_v4  ;;  %774 = vadd.xlane.f32.xlu0 %v773_v5  ;;  %v736_v27 = vadd.f32 %v715_v63, %v714_v33  ;;  %v317_v33 = vadd.f32 %v315_v41, %v1172_v23 }
 0x782   :  { %737 = vadd.xlane.f32.xlu1 %v736_v27  ;;  %v739_v11 = vadd.f32 %v717_v51, %v716_v3 }
 0x784   :  { %740 = vadd.xlane.f32.xlu0 %v739_v11 }
 0x786   :  { %324 = vadd.xlane.f32.xlu1 %v323_v15 }
 0x788   :  { %793 = vadd.xlane.f32.xlu0 %v792_v6 }
 0x78a   :  { %797 = vadd.xlane.f32.xlu1 %v796_v22 }
 0x78c   :  { %787 = vadd.xlane.f32.xlu0 %v786_v46 }
 0x78e   :  { %757 = vadd.xlane.f32.xlu1 %v756_v26 }
 0x792   :  { %810 = vadd.xlane.f32.xlu1 %v809_v28 }
 0x7f7   :  { %v720_v31 = vpop.xlane.xlu1 %719 }
 0x7f9   :  { %v723_v34 = vpop.xlane.xlu0 %722 }
 0x7fa   :  { %v742_v36 = vadd.f32 %v723_v34, %v720_v31 }
 0x7ff   :  { %v726_v37 = vpop.xlane.xlu1 %725 }
 0x800   :  { %v743_v16 = vadd.f32 %v742_v36, %v726_v37 }
 0x803   :  { %v729_v35 = vpop.xlane.xlu1 %728 }
 0x804   :  { %v744_v60 = vadd.f32 %v743_v16, %v729_v35 }
 0x807   :  { %v732_v55 = vpop.xlane.xlu1 %731 }
 0x808   :  { %v745_v39 = vadd.f32 %v744_v60, %v732_v55 }
 0x809   :  { %v735_v61 = vpop.xlane.xlu0 %734 }
 0x80a   :  { %v746_v49 = vadd.f32 %v745_v39, %v735_v61 }
 0x80d   :  { %v775_v43 = vpop.xlane.xlu0 %774 }
 0x80e   :  { %v778_v50 = vadd.f32 %v777_v42, %v775_v43 }
 0x80f   :  { %v738_v57 = vpop.xlane.xlu1 %737 }
 0x810   :  { %v779_v52 = vrot.slane %v778_v50, 4  ;;  %v747_v59 = vadd.f32 %v746_v49, %v738_v57 }
 0x811   :  { %v741_v44 = vpop.xlane.xlu0 %740 }
 0x812   :  { %v780_v47 = vadd.f32 %v779_v52, %v778_v50  ;;  %v748_v54 = vadd.f32 %v747_v59, %v741_v44 }
 0x813   :  { %v325_v56 = vpop.xlane.xlu1 %324 }
 0x814   :  { %v749_v2 = vrot.slane %v748_v54, 4  ;;  %v327_v63 = vsub.f32 %v317_v33, %v325_v56  ;;  %v781_v1 = vrot.slane %v780_v47, 2 }
 0x815   :  { %v794_v27 = vpop.xlane.xlu0 %793 }
 0x816   :  { %v750_v3 = vadd.f32 %v749_v2, %v748_v54  ;;  %v328_v4 = vadd.f32 %v327_v63, %v326_v62  ;;  %v782_v9 = vadd.f32 %v781_v1, %v780_v47 }
 0x817   :  { %v798_v5 = vpop.xlane.xlu1 %797 }
 0x818   :  { %v751_v8 = vrot.slane %v750_v3, 2  ;;  %v329_v51 = vrot.slane %v328_v4, 4  ;;  %v800_v0 = vsel %vm799_vm0, %v798_v5, 0.0  ;;  %v783_v14 = vrot.slane %v782_v9, 1 }
 0x819   :  { %v801_v10 = vadd.f32 %v800_v0, %v794_v27  ;;  %v788_v30 = vpop.xlane.xlu0 %787 }
 0x81a   :  { %v752_v17 = vadd.f32 %v751_v8, %v750_v3  ;;  %v330_v11 = vadd.f32 %v329_v51, %v328_v4  ;;  %v784_v25 = vadd.f32 %v783_v14, %v782_v9 }
 0x81b   :  { %v802_v12 = vrot.slane %v801_v10, 4  ;;  %v758_v22 = vpop.xlane.xlu1 %757 }
 0x81c   :  { %v753_v13 = vrot.slane %v752_v17, 1  ;;  %v331_v23 = vrot.slane %v330_v11, 2 }
 0x81d   :  { %v803_v15 = vadd.f32 %v802_v12, %v801_v10 }
 0x81e   :  { %v332_v20 = vadd.f32 %v331_v23, %v330_v11  ;;  %v754_v21 = vadd.f32 %v753_v13, %v752_v17 }
 0x81f   :  { %v804_v6 = vrot.slane %v803_v15, 2  ;;  %v811_v7 = vpop.xlane.xlu1 %810 }
 0x820   :  { %v333_v19 = vrot.slane %v332_v20, 1  ;;  %v814_v24 = vsel %vm813_vm2, %v754_v21, 0.0 }
 0x821   :  { %v805_v46 = vadd.f32 %v804_v6, %v803_v15  ;;  %v816_v26 = vsel %vm815_vm3, %v758_v22, %v814_v24 }
 0x822   :  { %v818_v28 = vsel %vm817_vm4, %v784_v25, %v816_v26  ;;  %v334_v29 = vadd.f32 %v333_v19, %v332_v20 }
 0x823   :  { %v806_v53 = vrot.slane %v805_v46, 1  ;;  %v820_v31 = vsel %vm819_vm5, %v788_v30, %v818_v28 }
 0x824   :  { %v335_v34 = vmul.f32 0.0625, %v334_v29 }
 0x825   :  { %v807_v32 = vadd.f32 %v806_v53, %v805_v46 }
 0x827   :  { %v822_v37 = vsel %vm821_vm6, %v807_v32, %v820_v31 }
 0x828   :  { %v824_v35 = vsel %vm823_vm7, %v811_v7, %v822_v37 }
 0x829   :  { %v826_v36 = vsel %vm825_vm8, %v335_v34, %v824_v35 }
 0x82a   :  { %828 = vst.msk [vmem:[#allocation2] sm:$0x1] %vm827_vm9, %v826_v36 }
 0x82b   :  { %941 = shalt.err (!%p938_p4)
}
 0x82c   :  { %s942_s21 = scalar_lea.hbm %s1287_s8, 16 }
 0x82d   :  { %p943_p5 = scmp.ne.s32.totalorder %s1287_s8, %s942_s21  ;;  %p946_p6 = scmp.lt.u32.totalorder %s942_s21, %s1287_s8 }
 0x82f   :  { %p948_p7 = pnand %p946_p6, %p943_p5 }
 0x831   :  { %951 = shalt.err (!%p948_p7)
}
 0x832   :  { %838 = dma.vmem_to_hbm [thread:$0]  %s836_s7, 16, %s1287_s8, [#allocation3]  }
 0x833   :  { %952 = dma.done.wait [#allocation3], 16  }
 0x834   :  { %953 = vsyncadd [#allocation3], 4294967280 }
 0x835   :  { %842 = vsyncpa [#allocation3], 1 }

</bundles_post_ra>
